<compile_context>
chip_gen: v5e
topology: v5e:2x2
jax: 0.10.0
libtpu: 0.0.40
codegen_flags: <defaults>
</compile_context>

<pallas_src>
import jax
import jax.numpy as jnp
from jax.experimental import pallas as pl
from jax.experimental.pallas import tpu as pltpu


def _round_up(n, m):
    return ((n + m - 1) // m) * m


def _ae_kernel(x_ref,
               w1_ref, b1_ref,
               w2_ref, b2_ref,
               w3_ref, b3_ref,
               w4_ref, b4_ref,
               m_ref,
               recon_ref):
    # One (TB, F) batch tile per grid step. bf16 MXU inputs, fp32 accumulate,
    # fp32 elementwise.
    x = x_ref[...]

    h1 = jnp.dot(x.astype(jnp.bfloat16), w1_ref[...],
                 preferred_element_type=jnp.float32) + b1_ref[...]
    h1 = jnp.maximum(h1, 0.0)

    code = jnp.dot(h1.astype(jnp.bfloat16), w2_ref[...],
                   preferred_element_type=jnp.float32) + b2_ref[...]
    code = jnp.maximum(code, 0.0) * m_ref[...]           # (TB, L) * (1, L)

    h2 = jnp.dot(code.astype(jnp.bfloat16), w3_ref[...],
                 preferred_element_type=jnp.float32) + b3_ref[...]
    h2 = jnp.maximum(h2, 0.0)

    logits = jnp.dot(h2.astype(jnp.bfloat16), w4_ref[...],
                     preferred_element_type=jnp.float32) + b4_ref[...]

    # sigmoid: exp on the EUP; approx reciprocal also on the EUP (frees VALU).
    recon_ref[...] = pl.reciprocal(1.0 + jnp.exp(-logits), approx=True)


def ae_forward(x, params, *, block_b=256):
    """x: (B, input_shape) float32.  params: dict of weights/biases/mask."""
    B, F = x.shape
    L = params["w1"].shape[1]

    # Hard-sigmoid of the learned mask, computed once outside the kernel.
    m = jnp.clip(params["mask"] * (1.0 / 6.0) + 0.5, 0.0, 1.0)    # (1, L)

    # Weights as bf16 (native MXU dtype, half the DMA bytes); biases fp32.
    w1 = params["w1"].astype(jnp.bfloat16)
    w2 = params["w2"].astype(jnp.bfloat16)
    w3 = params["w3"].astype(jnp.bfloat16)
    w4 = params["w4"].astype(jnp.bfloat16)
    b1, b2, b3, b4 = params["b1"], params["b2"], params["b3"], params["b4"]

    # Batch tile: multiple of 8 (fp32 sublane); pad B up to a whole number of
    # tiles, slice the padding back off after the call.
    TB = max(8, min(_round_up(block_b, 8), _round_up(B, 8)))
    B_pad = _round_up(B, TB)
    x_p = x if B_pad == B else jnp.pad(x, ((0, B_pad - B), (0, 0)))

    batch_map = lambda i: (i, 0)
    const_map = lambda i: (0, 0)

    recon = pl.pallas_call(
        _ae_kernel,
        out_shape=jax.ShapeDtypeStruct((B_pad, F), jnp.float32),
        grid=(B_pad // TB,),
        in_specs=[
            pl.BlockSpec((TB, F), batch_map),          # x tile (pipelined)
            pl.BlockSpec((F, L), const_map),           # W1 (VMEM-resident)
            pl.BlockSpec((1, L), const_map),           # b1
            pl.BlockSpec((L, L), const_map),           # W2
            pl.BlockSpec((1, L), const_map),           # b2
            pl.BlockSpec((L, L), const_map),           # W3
            pl.BlockSpec((1, L), const_map),           # b3
            pl.BlockSpec((L, F), const_map),           # W4
            pl.BlockSpec((1, F), const_map),           # b4
            pl.BlockSpec((1, L), const_map),           # hard-sigmoid(mask)
        ],
        out_specs=pl.BlockSpec((TB, F), batch_map),
        compiler_params=pltpu.CompilerParams(
            dimension_semantics=("parallel",)),        # v7x: batch over 2 TCs
    )(x_p, w1, b1, w2, b2, w3, b3, w4, b4, m)

    if B_pad != B:
        recon = recon[:B]
    return recon, m.reshape(L)


def init_params(key, input_shape, latent_dims):
    """Deterministic synthetic parameter init (shapes match the torch module)."""
    ks = jax.random.split(key, 9)

    def linear(kw, kb, fan_in, fan_out):
        bound = 1.0 / jnp.sqrt(fan_in)
        w = jax.random.uniform(kw, (fan_in, fan_out), jnp.float32, -bound, bound)
        b = jax.random.uniform(kb, (1, fan_out), jnp.float32, -bound, bound)
        return w, b

    w1, b1 = linear(ks[0], ks[1], input_shape, latent_dims)
    w2, b2 = linear(ks[2], ks[3], latent_dims, latent_dims)
    w3, b3 = linear(ks[4], ks[5], latent_dims, latent_dims)
    w4, b4 = linear(ks[6], ks[7], latent_dims, input_shape)

    # mask_initial = round(normal(mean=0.5, std=1.0)) per latent dim
    mask = jnp.round(
        jax.random.normal(ks[8], (1, latent_dims), jnp.float32) + 0.5
    )

    return dict(w1=w1, b1=b1, w2=w2, b2=b2, w3=w3, b3=b3, w4=w4, b4=b4, mask=mask)


def _reference_forward(x, p):
    """Pure-JAX fp32 reference (exact PyTorch semantics) for correctness check."""
    h1 = jax.nn.relu(x @ p["w1"] + p["b1"])
    code = jax.nn.relu(h1 @ p["w2"] + p["b2"])
    m = jnp.clip(p["mask"] / 6.0 + 0.5, 0.0, 1.0)
    code = code * m
    h2 = jax.nn.relu(code @ p["w3"] + p["b3"])
    recon = jax.nn.sigmoid(h2 @ p["w4"] + p["b4"])
    return recon, m.reshape(-1)


if __name__ == "__main__":
    key = jax.random.PRNGKey(0)
    k_x, k_p = jax.random.split(key)

    B, INPUT_SHAPE, LATENT = 12, 64, 32
    x = jax.random.uniform(k_x, (B, INPUT_SHAPE), jnp.float32)
    params = init_params(k_p, INPUT_SHAPE, LATENT)

    # block_b=8 exercises the batch grid (2 steps) and the pad/slice path.
    recon, mask = ae_forward(x, params, block_b=8)
    jax.block_until_ready((recon, mask))

    ref_recon, ref_mask = _reference_forward(x, params)
    assert recon.shape == (B, INPUT_SHAPE)
    assert mask.shape == (LATENT,)
    # bf16 MXU inputs (fp32 accumulate) + approx reciprocal => ~1e-2 tolerance
    assert jnp.allclose(recon, ref_recon, atol=2e-2, rtol=2e-2)
    assert jnp.allclose(mask, ref_mask, atol=1e-6, rtol=1e-6)

    print("KERNEL_OK")
</pallas_src>

<mosaic_0001>
module attributes {stable_mosaic.version = 11 : i64} {
  func.func @_ae_kernel(%arg0: i32, %arg1: memref<8x64xf32, #tpu.memory_space<vmem>>, %arg2: memref<64x32xbf16, #tpu.memory_space<vmem>>, %arg3: memref<1x32xf32, #tpu.memory_space<vmem>>, %arg4: memref<32x32xbf16, #tpu.memory_space<vmem>>, %arg5: memref<1x32xf32, #tpu.memory_space<vmem>>, %arg6: memref<32x32xbf16, #tpu.memory_space<vmem>>, %arg7: memref<1x32xf32, #tpu.memory_space<vmem>>, %arg8: memref<32x64xbf16, #tpu.memory_space<vmem>>, %arg9: memref<1x64xf32, #tpu.memory_space<vmem>>, %arg10: memref<1x32xf32, #tpu.memory_space<vmem>>, %arg11: memref<8x64xf32, #tpu.memory_space<vmem>>) attributes {dimension_semantics = [#tpu.dimension_semantics<parallel>], iteration_bounds = array<i64: 2>, scalar_prefetch = 0 : i64, scratch_operands = 0 : i64, tpu.core_type = #tpu.core_type<tc>, window_params = [{transform_indices = @transform_0, window_bounds = array<i64: 8, 64>}, {pipeline_mode = #tpu.pipeline_mode<synchronous>, transform_indices = @transform_1, window_bounds = array<i64: 64, 32>}, {pipeline_mode = #tpu.pipeline_mode<synchronous>, transform_indices = @transform_2, window_bounds = array<i64: 1, 32>}, {pipeline_mode = #tpu.pipeline_mode<synchronous>, transform_indices = @transform_3, window_bounds = array<i64: 32, 32>}, {pipeline_mode = #tpu.pipeline_mode<synchronous>, transform_indices = @transform_4, window_bounds = array<i64: 1, 32>}, {pipeline_mode = #tpu.pipeline_mode<synchronous>, transform_indices = @transform_5, window_bounds = array<i64: 32, 32>}, {pipeline_mode = #tpu.pipeline_mode<synchronous>, transform_indices = @transform_6, window_bounds = array<i64: 1, 32>}, {pipeline_mode = #tpu.pipeline_mode<synchronous>, transform_indices = @transform_7, window_bounds = array<i64: 32, 64>}, {pipeline_mode = #tpu.pipeline_mode<synchronous>, transform_indices = @transform_8, window_bounds = array<i64: 1, 64>}, {pipeline_mode = #tpu.pipeline_mode<synchronous>, transform_indices = @transform_9, window_bounds = array<i64: 1, 32>}, {transform_indices = @transform_10, window_bounds = array<i64: 8, 64>}]} {
    %c0 = arith.constant 0 : index
    %c0_0 = arith.constant 0 : index
    %0 = vector.load %arg1[%c0, %c0_0] : memref<8x64xf32, #tpu.memory_space<vmem>>, vector<8x64xf32>
    %1 = arith.truncf %0 : vector<8x64xf32> to vector<8x64xbf16>
    %c0_1 = arith.constant 0 : index
    %c0_2 = arith.constant 0 : index
    %2 = vector.load %arg2[%c0_1, %c0_2] : memref<64x32xbf16, #tpu.memory_space<vmem>>, vector<64x32xbf16>
    %cst = arith.constant dense<0.000000e+00> : vector<8x32xf32>
    %3 = tpu.matmul %1, %2, %cst {dimension_numbers = #tpu.dot_dimension_numbers<[1], [0], [0], [1], [0, 0, 1, 1], [], []>} : vector<8x64xbf16>, vector<64x32xbf16>, vector<8x32xf32> -> vector<8x32xf32>
    %c0_3 = arith.constant 0 : index
    %c0_4 = arith.constant 0 : index
    %4 = vector.load %arg3[%c0_3, %c0_4] : memref<1x32xf32, #tpu.memory_space<vmem>>, vector<1x32xf32>
    %5 = vector.broadcast %4 : vector<1x32xf32> to vector<8x32xf32>
    %6 = arith.addf %3, %5 : vector<8x32xf32>
    %cst_5 = arith.constant 0.000000e+00 : f32
    %7 = vector.broadcast %cst_5 : f32 to vector<8x32xf32>
    %8 = arith.maximumf %6, %7 : vector<8x32xf32>
    %9 = arith.truncf %8 : vector<8x32xf32> to vector<8x32xbf16>
    %c0_6 = arith.constant 0 : index
    %c0_7 = arith.constant 0 : index
    %10 = vector.load %arg4[%c0_6, %c0_7] : memref<32x32xbf16, #tpu.memory_space<vmem>>, vector<32x32xbf16>
    %cst_8 = arith.constant dense<0.000000e+00> : vector<8x32xf32>
    %11 = tpu.matmul %9, %10, %cst_8 {dimension_numbers = #tpu.dot_dimension_numbers<[1], [0], [0], [1], [0, 0, 1, 1], [], []>} : vector<8x32xbf16>, vector<32x32xbf16>, vector<8x32xf32> -> vector<8x32xf32>
    %c0_9 = arith.constant 0 : index
    %c0_10 = arith.constant 0 : index
    %12 = vector.load %arg5[%c0_9, %c0_10] : memref<1x32xf32, #tpu.memory_space<vmem>>, vector<1x32xf32>
    %13 = vector.broadcast %12 : vector<1x32xf32> to vector<8x32xf32>
    %14 = arith.addf %11, %13 : vector<8x32xf32>
    %cst_11 = arith.constant 0.000000e+00 : f32
    %15 = vector.broadcast %cst_11 : f32 to vector<8x32xf32>
    %16 = arith.maximumf %14, %15 : vector<8x32xf32>
    %c0_12 = arith.constant 0 : index
    %c0_13 = arith.constant 0 : index
    %17 = vector.load %arg10[%c0_12, %c0_13] : memref<1x32xf32, #tpu.memory_space<vmem>>, vector<1x32xf32>
    %18 = vector.broadcast %17 : vector<1x32xf32> to vector<8x32xf32>
    %19 = arith.mulf %16, %18 : vector<8x32xf32>
    %20 = arith.truncf %19 : vector<8x32xf32> to vector<8x32xbf16>
    %c0_14 = arith.constant 0 : index
    %c0_15 = arith.constant 0 : index
    %21 = vector.load %arg6[%c0_14, %c0_15] : memref<32x32xbf16, #tpu.memory_space<vmem>>, vector<32x32xbf16>
    %cst_16 = arith.constant dense<0.000000e+00> : vector<8x32xf32>
    %22 = tpu.matmul %20, %21, %cst_16 {dimension_numbers = #tpu.dot_dimension_numbers<[1], [0], [0], [1], [0, 0, 1, 1], [], []>} : vector<8x32xbf16>, vector<32x32xbf16>, vector<8x32xf32> -> vector<8x32xf32>
    %c0_17 = arith.constant 0 : index
    %c0_18 = arith.constant 0 : index
    %23 = vector.load %arg7[%c0_17, %c0_18] : memref<1x32xf32, #tpu.memory_space<vmem>>, vector<1x32xf32>
    %24 = vector.broadcast %23 : vector<1x32xf32> to vector<8x32xf32>
    %25 = arith.addf %22, %24 : vector<8x32xf32>
    %cst_19 = arith.constant 0.000000e+00 : f32
    %26 = vector.broadcast %cst_19 : f32 to vector<8x32xf32>
    %27 = arith.maximumf %25, %26 : vector<8x32xf32>
    %28 = arith.truncf %27 : vector<8x32xf32> to vector<8x32xbf16>
    %c0_20 = arith.constant 0 : index
    %c0_21 = arith.constant 0 : index
    %29 = vector.load %arg8[%c0_20, %c0_21] : memref<32x64xbf16, #tpu.memory_space<vmem>>, vector<32x64xbf16>
    %cst_22 = arith.constant dense<0.000000e+00> : vector<8x64xf32>
    %30 = tpu.matmul %28, %29, %cst_22 {dimension_numbers = #tpu.dot_dimension_numbers<[1], [0], [0], [1], [0, 0, 1, 1], [], []>} : vector<8x32xbf16>, vector<32x64xbf16>, vector<8x64xf32> -> vector<8x64xf32>
    %c0_23 = arith.constant 0 : index
    %c0_24 = arith.constant 0 : index
    %31 = vector.load %arg9[%c0_23, %c0_24] : memref<1x64xf32, #tpu.memory_space<vmem>>, vector<1x64xf32>
    %32 = vector.broadcast %31 : vector<1x64xf32> to vector<8x64xf32>
    %33 = arith.addf %30, %32 : vector<8x64xf32>
    %cst_25 = arith.constant 0.000000e+00 : f32
    %34 = vector.broadcast %cst_25 : f32 to vector<8x64xf32>
    %35 = arith.subf %34, %33 : vector<8x64xf32>
    %36 = math.exp %35 : vector<8x64xf32>
    %cst_26 = arith.constant 1.000000e+00 : f32
    %37 = vector.broadcast %cst_26 : f32 to vector<8x64xf32>
    %38 = arith.addf %37, %36 : vector<8x64xf32>
    %39 = tpu.reciprocal %38 {approx = true} : vector<8x64xf32> -> vector<8x64xf32>
    %c0_27 = arith.constant 0 : index
    %c0_28 = arith.constant 0 : index
    %40 = vector.load %arg11[%c0_27, %c0_28] : memref<8x64xf32, #tpu.memory_space<vmem>>, vector<8x64xf32>
    tpu.vector_store %arg11[%c0_27, %c0_28], %39 {strides = array<i32>} : memref<8x64xf32, #tpu.memory_space<vmem>>, vector<8x64xf32>,
    return
  }
  func.func @transform_0(%arg0: i32) -> (i32, i32) {
    %c0_i32 = arith.constant 0 : i32
    %c0_i32_0 = arith.constant 0 : i32
    return %arg0, %c0_i32 : i32, i32
  }
  func.func @transform_1(%arg0: i32) -> (i32, i32) {
    %c0_i32 = arith.constant 0 : i32
    %c0_i32_0 = arith.constant 0 : i32
    %c0_i32_1 = arith.constant 0 : i32
    return %c0_i32, %c0_i32_0 : i32, i32
  }
  func.func @transform_2(%arg0: i32) -> (i32, i32) {
    %c0_i32 = arith.constant 0 : i32
    %c0_i32_0 = arith.constant 0 : i32
    %c0_i32_1 = arith.constant 0 : i32
    return %c0_i32, %c0_i32_0 : i32, i32
  }
  func.func @transform_3(%arg0: i32) -> (i32, i32) {
    %c0_i32 = arith.constant 0 : i32
    %c0_i32_0 = arith.constant 0 : i32
    %c0_i32_1 = arith.constant 0 : i32
    return %c0_i32, %c0_i32_0 : i32, i32
  }
  func.func @transform_4(%arg0: i32) -> (i32, i32) {
    %c0_i32 = arith.constant 0 : i32
    %c0_i32_0 = arith.constant 0 : i32
    %c0_i32_1 = arith.constant 0 : i32
    return %c0_i32, %c0_i32_0 : i32, i32
  }
  func.func @transform_5(%arg0: i32) -> (i32, i32) {
    %c0_i32 = arith.constant 0 : i32
    %c0_i32_0 = arith.constant 0 : i32
    %c0_i32_1 = arith.constant 0 : i32
    return %c0_i32, %c0_i32_0 : i32, i32
  }
  func.func @transform_6(%arg0: i32) -> (i32, i32) {
    %c0_i32 = arith.constant 0 : i32
    %c0_i32_0 = arith.constant 0 : i32
    %c0_i32_1 = arith.constant 0 : i32
    return %c0_i32, %c0_i32_0 : i32, i32
  }
  func.func @transform_7(%arg0: i32) -> (i32, i32) {
    %c0_i32 = arith.constant 0 : i32
    %c0_i32_0 = arith.constant 0 : i32
    %c0_i32_1 = arith.constant 0 : i32
    return %c0_i32, %c0_i32_0 : i32, i32
  }
  func.func @transform_8(%arg0: i32) -> (i32, i32) {
    %c0_i32 = arith.constant 0 : i32
    %c0_i32_0 = arith.constant 0 : i32
    %c0_i32_1 = arith.constant 0 : i32
    return %c0_i32, %c0_i32_0 : i32, i32
  }
  func.func @transform_9(%arg0: i32) -> (i32, i32) {
    %c0_i32 = arith.constant 0 : i32
    %c0_i32_0 = arith.constant 0 : i32
    %c0_i32_1 = arith.constant 0 : i32
    return %c0_i32, %c0_i32_0 : i32, i32
  }
  func.func @transform_10(%arg0: i32) -> (i32, i32) {
    %c0_i32 = arith.constant 0 : i32
    %c0_i32_0 = arith.constant 0 : i32
    return %arg0, %c0_i32 : i32, i32
  }
}

</mosaic_0001>

<bundles_post_ra>
// kernel: tpu_custom_call.1
= control target key start
LH: loop header
LB: loop body
LE: loop exit
PB: predicated region body
PF: predicated region fallthrough
CT: control target
= control target key end

     0   :  { %s1063_s0 = inlined_call_operand.vmem [shape: f32[16,64], index: 0, kind: input, shape index: {}]   ;;  %s1064_s1 = inlined_call_operand.vmem [shape: bf16[64,32], index: 1, kind: input, shape index: {}]   ;;  %s1065_s2 = inlined_call_operand.vmem [shape: f32[1,32], index: 2, kind: input, shape index: {}]   ;;  %s1066_s3 = inlined_call_operand.vmem [shape: bf16[32,32], index: 3, kind: input, shape index: {}]   ;;  %s1067_s4 = inlined_call_operand.vmem [shape: f32[1,32], index: 4, kind: input, shape index: {}]   ;;  %s1068_s5 = inlined_call_operand.vmem [shape: bf16[32,32], index: 5, kind: input, shape index: {}]   ;;  %s1069_s6 = inlined_call_operand.vmem [shape: f32[1,32], index: 6, kind: input, shape index: {}]   ;;  %s1070_s7 = inlined_call_operand.hbm [shape: bf16[32,64], index: 7, kind: input, shape index: {}]   ;;  %s1071_s8 = inlined_call_operand.vmem [shape: f32[1,64], index: 8, kind: input, shape index: {}]   ;;  %s1072_s9 = inlined_call_operand.vmem [shape: f32[1,32], index: 9, kind: input, shape index: {}]   ;;  %s1073_s10 = inlined_call_operand.hbm [shape: f32[16,64], index: 10, kind: output, shape index: {}]  }
   0x1   :  { %1074 = sst [smem:[#allocation8_spill]] %s1070_s7 }
   0x2   :  { %15 = vsyncpa [#allocation3], 0 }
   0x3   :  { %16 = vsyncpa [#allocation4], 0 }
   0x4   :  { %18 = vsyncpa [#allocation4 + $0x1], 0  ;;  %s924_s13 = smov 0   ;;  %s926_s14 = smov 0  }
   0x5   :  { %s928_s15 = smov 0   ;;  %s930_s16 = smov 0  }
   0x6 LB: > { %s945_s17 = sadd.s32 4294967295, %s864_s16   ;;  %s641_s18 = sadd.s32 4294967294, %s864_s16   ;;  %s864_s16 = sphi %s930_s16, %s1081_s16   ;;  %s860_s15 = sphi %s928_s15, %s1080_s15   ;;  %s856_s14 = sphi %s926_s14, %s1079_s14   ;;  %s852_s13 = sphi %s924_s13, %s1078_s13  }
   0x7   : > { %s949_s19 = sadd.s32 1, %s864_s16   ;;  %s246_s20 = sadd.s32 1, %s860_s15 }
   0x8   : > { %s243_s21 = ssub.s32 %s864_s16, %s949_s19  ;;  %p256_p0 = scmp.ne.s32.totalorder %s860_s15, %s856_s14 }
   0x9   : > { %p244_p1 = scmp.eq.s32.totalorder %s243_s21, 0  ;;  %p257_p2 = scmp.eq.s32.totalorder %s945_s17, 1 }
   0xa   : > { %p262_p3 = scmp.ne.s32.totalorder %s856_s14, %s852_s13  ;;  %p263_p4 = scmp.eq.s32.totalorder %s641_s18, 1 }
   0xb   : > { %s960_s22 = scalar_select %p244_p1, %s860_s15, %s246_s20  }
   0xc   : > { %p962_p5 = por %p257_p2, %p256_p0  ;;  %p966_p6 = por %p263_p4, %p262_p3 }
   0xd   : > { %p642_p7 = scmp.ge.s32.totalorder %s864_s16, 1  ;;  %p270_p8 = scmp.lt.s32.totalorder %s864_s16, 3 }
   0xe   : > { %p721_p9 = scmp.eq.s32.totalorder %s945_s17, 0  ;;  %s1077_s7 = sld [smem:[#allocation8_spill]] }
   0xf   : > { %p271_p10 = pnand %p642_p7, %p270_p8  ;;  %s866_s28 = smov [#allocation2]  }
  0x10   : > { %s301_s29 = sshll.u32 %s866_s28, 4  ;;  %s867_s30 = smov 64   ;;  %s302_s29 = int_to_ptr.vmem [resolvable:$true] %s301_s29 }
  0x11   : > { %p713_p11 = pneg %p271_p10  ;;  %s868_s11 = smov 4  }
  0x12   : > { %330 = sbr.rel (%p271_p10) target bundleno = 601 (0x259), region = 60 }
  0x13   : > { %p714_p12 = pnand %p721_p9, %p713_p11 }
  0x14   : > { %s299_s27 = sshll.u32 %s1077_s7, 4  ;;  %s300_s27 = int_to_ptr.hbm [resolvable:$true] %s299_s27 }
  0x15   : > { %716 = dma.hbm_to_vmem [thread:$0]  (!%p714_p12), %s300_s27, 256, %s302_s29, [#allocation3], %s867_s30, %s867_s30, %s868_s11  }
  0x17   : > { %843 = dma.done.wait (%p721_p9), [#allocation3], 256  }
  0x18   : > { %845 = vsyncadd (%p721_p9), [#allocation3], 4294967040  ;;  %p368_p13 = scmp.lt.s32.totalorder %s945_s17, 1  ;;  %v700_v0 = vld [vmem:[%s1064_s1 + $0x18] sm:$0xff]  ;;  %v699_v1 = vld [vmem:[%s1064_s1 + $0x10] sm:$0xff]  ;;  %vm411_vm0 = vcmask 523264  }
  0x19   : > { %419 = vmatpush.bf16.msra.mxu0 %v700_v0  ;;  %v698_v2 = vld [vmem:[%s1064_s1 + $0x8] sm:$0xff]  ;;  %v697_v3 = vld [vmem:[%s1064_s1] sm:$0xff]  ;;  %vm450_vm1 = vcmask 261120   ;;  %s365_s7 = sand.u32 1, %s856_s14   ;;  %s694_s29 = sshll.u32 %s945_s17, 3 }
  0x1a   : > { %s369_s20 = scalar_select %p368_p13, %s945_s17, 1  ;;  %v702_v6 = vld [vmem:[%s1066_s3 + $0x8] sm:$0xff]  ;;  %v701_v7 = vld [vmem:[%s1066_s3] sm:$0xff] }
  0x1b   : > { %460 = vmatpush.bf16.msra.mxu1 %v702_v6  ;;  %v759_v8 = vld [vmem:[%s1065_s2] ss:$0 sm:$0xff]  ;;  %v704_v14 = vld [vmem:[%s1068_s5 + $0x8] sm:$0xff]  ;;  %s647_s28 = sshll.u32 %s365_s7, 3  ;;  %s565_s12 = scalar_lea.hbm %s1073_s10, %s694_s29 }
  0x1c   : > { %s648_s26 = sshll.u32 %s369_s20, 3  ;;  %503 = vmatpush.bf16.msra.mxu2 %v704_v14  ;;  %v703_v15 = vld [vmem:[%s1068_s5] sm:$0xff]  ;;  %v706_v24 = vld [vmem:[#allocation2 + $0x8] sm:$0xff]  ;;  %s367_s18 = scalar_lea.vmem [#allocation5], %s647_s28 }
  0x1d   : > { %420 = vmatpush.bf16.msra.mxu0 %v699_v1  ;;  %s371_s11 = scalar_lea.vmem %s1063_s0, %s648_s26  ;;  %v760_v16 = vld [vmem:[%s1067_s4] ss:$0 sm:$0xff]  ;;  %541 = vmatpush.bf16.msra.mxu3 %v706_v24  ;;  %s567_s20 = sshll.u32 %s367_s18, 4  ;;  %s568_s20 = int_to_ptr.vmem [resolvable:$true] %s567_s20 }
  0x1e   : > { %v373_v4 = vld [vmem:[%s371_s11] sm:$0xff]  ;;  %s569_s21 = sshll.u32 %s565_s12, 4  ;;  %s555_s25 = scalar_lea.sflag [#allocation4], %s365_s7  ;;  %s570_s21 = int_to_ptr.hbm [resolvable:$true] %s569_s21 }
  0x1f   : > { %v374_v5 = vpack.c.bf16 %v373_v4, %v373_v4  ;;  %461 = vmatpush.bf16.msra.mxu1 %v701_v7  ;;  %v761_v19 = vld [vmem:[%s1072_s9] ss:$0 sm:$0xff]  ;;  %s812_s26 = sshra.s32 %s570_s21, 4  ;;  %s818_s29 = scalar_lea.hbm %s1073_s10, 16  ;;  %s813_s26 = int_to_ptr.hbm [resolvable:$true] %s812_s26 }
  0x20   : > { %504 = vmatpush.bf16.msra.mxu2 %v703_v15  ;;  %v705_v25 = vld [vmem:[#allocation2] sm:$0xff]  ;;  %s814_s17 = scalar_lea.hbm %s813_s26, 8  ;;  %p819_p3 = scmp.lt.s32.totalorder %s813_s26, %s1073_s10 }
  0x21   : > { %421 = vmatpush.bf16.msra.mxu0 %v698_v2  ;;  %542 = vmatpush.bf16.msra.mxu3 %v705_v25  ;;  %v762_v26 = vld [vmem:[%s1069_s6] ss:$0 sm:$0xff]  ;;  %p815_p0 = scmp.ne.s32.totalorder %s813_s26, %s814_s17  ;;  %p820_p4 = scmp.lt.s32.totalorder %s818_s29, %s814_s17 }
  0x22   : > { %v763_v32 = vld [vmem:[%s1071_s8] ss:$0 sm:$0xff] }
  0x23   : > { %p816_p1 = pnand %p815_p0, %p962_p5  ;;  %p821_p7 = por %p820_p4, %p819_p3 }
  0x25   : > { %422 = vmatpush.bf16.msra.mxu0 %v697_v3  ;;  %p817_p2 = pneg %p816_p1 }
  0x27   : > { %p822_p8 = pnand %p821_p7, %p817_p2 }
  0x28   : > { %665 = vmatmul.msk.bf16.vlgmr.msra.gmra.mxu0 %vm411_vm0, %v374_v5 }
  0xa5   : > { %v424_v9 = vpop.f32.mrf.mxu0 }
  0xa6   : > { %v425_v10 = vadd.f32 %v759_v8, %v424_v9 }
  0xa8   : > { %v428_v11 = vmax.f32 %v425_v10, 0.0 }
  0xaa   : > { %v429_v12 = vpack.c.bf16 %v428_v11, %v428_v11 }
  0xac   : > { %674 = vmatmul.msk.bf16.vlgmr.msra.gmra.mxu1 %vm450_vm1, %v429_v12 }
  0xad   : > { %v426_v13 = vpop.f32.mrf.mxu0 }
 0x129   : > { %v463_v17 = vpop.f32.mrf.mxu1 }
 0x12a   : > { %v464_v18 = vadd.f32 %v760_v16, %v463_v17 }
 0x12c   : > { %v467_v20 = vmax.f32 %v464_v18, 0.0 }
 0x12e   : > { %v472_v21 = vmul.f32 %v761_v19, %v467_v20 }
 0x130   : > { %v473_v22 = vpack.c.bf16 %v472_v21, %v472_v21 }
 0x131   : > { %v465_v23 = vpop.f32.mrf.mxu1 }
 0x132   : > { %683 = vmatmul.msk.bf16.vlgmr.msra.gmra.mxu2 %vm450_vm1, %v473_v22 }
 0x1b5   : > { %v506_v27 = vpop.f32.mrf.mxu2 }
 0x1b6   : > { %v507_v28 = vadd.f32 %v762_v26, %v506_v27 }
 0x1b8   : > { %v510_v29 = vmax.f32 %v507_v28, 0.0 }
 0x1ba   : > { %v511_v30 = vpack.c.bf16 %v510_v29, %v510_v29 }
 0x1bc   : > { %692 = vmatmul.msk.bf16.vlgmr.msra.gmra.mxu3 %vm450_vm1, %v511_v30 }
 0x1bd   : > { %v508_v31 = vpop.f32.mrf.mxu2 }
 0x23f   : > { %v544_v33 = vpop.f32.mrf.mxu3 }
 0x240   : > { %v545_v34 = vadd.f32 %v763_v32, %v544_v33 }
 0x242   : > { %v548_v35 = vsub.f32 0.0, %v545_v34 }
 0x244   : > { %v549_v36 = vmul.f32 1.442695, %v548_v35 }
 0x246   : > { %764 = vpow2.f32 %v549_v36 }
 0x247   : > { %v546_v37 = vpop.f32.mrf.mxu3 }
 0x24c   : > { %v765_v38 = vpop.eup %764 }
 0x24d   : > { %v551_v39 = vadd.f32 1.0, %v765_v38 }
 0x24f   : > { %766 = vrcp.f32 %v551_v39 }
 0x255   : > { %v767_v40 = vpop.eup %766 }
 0x256   : > { %553 = vst.msk [vmem:[%s367_s18] sm:$0xff] %vm411_vm0, %v767_v40 }
 0x257   : > { %825 = shalt.err (!%p822_p8)
}
 0x258   : > { %711 = dma.vmem_to_hbm [thread:$0]  (%p962_p5), %s568_s20, 128, %s570_s21, %s555_s25  }
 0x259 PF: > { %p723_p9 = scmp.ge.s32.totalorder %s864_s16, 2  ;;  %s581_s7 = sand.u32 1, %s852_s13  }
 0x25a   : > { %s582_s12 = scalar_lea.sflag [#allocation4], %s581_s7 }
 0x25b   : > { %p718_p10 = pnand %p723_p9, %p966_p6 }
 0x25d   : > { %p719_p11 = pneg %p718_p10 }
 0x25f   : > { %847 = dma.done.wait (%p719_p11), %s582_s12, 128  }
 0x260   : > { %849 = vsyncadd (%p719_p11), %s582_s12, 4294967168  ;;  %p21_p12 = scmp.ge.s32.totalorder %s949_s19, 4   ;;  %s1078_s13 = smov %s856_s14 }
 0x261   : > { %s1079_s14 = smov %s860_s15  ;;  %s1080_s15 = smov %s960_s22 }
 0x262   : > { %s1081_s16 = smov %s949_s19  ;;  %23 = sbr.rel (!%p21_p12) target bundleno = 6 (0x6), region = 100 }
 0x267   :  { %588 = vsyncpa [#allocation3], 1 }
 0x268   :  { %590 = vsyncpa [#allocation3 + $0x1], 1 }
 0x269   :  { %591 = vsyncpa [#allocation4], 1 }
 0x26a   :  { %593 = vsyncpa [#allocation4 + $0x1], 1 }

</bundles_post_ra>
